<compile_context>
chip_gen: v5e
topology: v5e:2x2
jax: 0.10.0
libtpu: 0.0.40
codegen_flags: <defaults>
</compile_context>

<pallas_src>
import jax
import jax.numpy as jnp
from jax.experimental import pallas as pl
from jax.experimental.pallas import tpu as pltpu


def _round_up(x, m):
    return ((x + m - 1) // m) * m


def _combiner_kernel(h_ref, m_ref, w_ref, b_ref, o_ref, sum_acc, cnt_acc):
    # h_ref : (TB, TS, D_in)    m_ref : (TB, TS, 1)
    # w_ref : (D_in, D_out_p)   b_ref : (1, D_out_p)   o_ref : (TB, D_out_p)
    # sum_acc : (TB, D_in) f32  cnt_acc : (TB, 1) f32   (persist across k)
    k = pl.program_id(1)

    @pl.when(k == 0)
    def _init():
        sum_acc[...] = jnp.zeros_like(sum_acc)
        cnt_acc[...] = jnp.zeros_like(cnt_acc)

    h = h_ref[...].astype(jnp.float32)          # (TB, TS, D_in)
    m = m_ref[...].astype(jnp.float32)          # (TB, TS, 1) lane-broadcasts

    sum_acc[...] += jnp.sum(h * m, axis=1)      # masked partial sum (TB, D_in)
    cnt_acc[...] += jnp.sum(m, axis=1)          # valid-token partial count

    @pl.when(k == pl.num_programs(1) - 1)
    def _finalize():
        cnt = jnp.maximum(cnt_acc[...], 1.0)    # clamp: all-pad rows -> mean 0
        pooled = sum_acc[...] * pl.reciprocal(cnt, approx=True)   # EUP divide
        out = jnp.dot(pooled, w_ref[...], preferred_element_type=jnp.float32)
        o_ref[...] = (out + b_ref[...]).astype(o_ref.dtype)


def combiner_forward(word_hidden, word_mask, weight, bias, *,
                     tile_b=256, tile_s=512):
    """word_hidden: [B, S, D_in], word_mask: [B, S],
    weight: [D_in, D_out] (transposed vs. torch.nn.Linear), bias: [D_out]
    -> [B, D_out]"""
    B, S, D_in = word_hidden.shape
    D_out = weight.shape[1]

    # ---- layout plumbing in the wrapper, not the kernel --------------------
    # Lane-dense output: pad D_out up to a multiple of 128 (zeros are inert).
    d_out_p = _round_up(D_out, 128)
    w_p = jnp.zeros((D_in, d_out_p), weight.dtype).at[:, :D_out].set(weight)
    b_p = jnp.zeros((1, d_out_p), bias.dtype).at[0, :D_out].set(bias)

    # Mask as (B, S, 1): S already on sublanes -> cheap broadcast in-kernel.
    m3 = word_mask.astype(word_hidden.dtype).reshape(B, S, 1)

    # Batch / sequence tiling.  Padding rows/tokens carry a zero mask, so they
    # contribute nothing to the sum or the count.
    tb = B if B <= tile_b else tile_b
    b_pad = B if B <= tile_b else _round_up(B, tile_b)
    ts = S if S <= tile_s else tile_s
    s_pad = S if S <= tile_s else _round_up(S, tile_s)

    h = word_hidden
    if b_pad != B or s_pad != S:
        h = jnp.pad(h, ((0, b_pad - B), (0, s_pad - S), (0, 0)))
        m3 = jnp.pad(m3, ((0, b_pad - B), (0, s_pad - S), (0, 0)))

    grid = (b_pad // tb, s_pad // ts)
    itemsize = jnp.dtype(h.dtype).itemsize

    # VMEM footprint: double-buffered input tiles + resident weight/bias +
    # resident output tile + accumulators (x2 headroom), kept under v7x's
    # 64 MiB physical VMEM.
    vmem_est = (2 * tb * ts * (D_in + 1) * itemsize     # h + mask tiles (x2 buf)
                + 2 * (D_in + 1) * d_out_p * 4          # weight + bias
                + 2 * tb * d_out_p * 4                  # output tile
                + tb * (D_in + 1) * 4)                  # accumulators
    vmem_limit = int(min(max(2 * vmem_est, 16 * 1024 * 1024),
                         60 * 1024 * 1024))

    cost = pl.CostEstimate(
        flops=2 * b_pad * s_pad * D_in + 2 * b_pad * D_in * d_out_p,
        transcendentals=b_pad,
        bytes_accessed=(b_pad * s_pad * (D_in + 1) * itemsize
                        + (D_in + 1) * d_out_p * 4
                        + b_pad * d_out_p * 4),
    )

    out_p = pl.pallas_call(
        _combiner_kernel,
        out_shape=jax.ShapeDtypeStruct((b_pad, d_out_p), jnp.float32),
        grid_spec=pltpu.PrefetchScalarGridSpec(
            num_scalar_prefetch=0,
            grid=grid,
            in_specs=[
                pl.BlockSpec((tb, ts, D_in), lambda i, k: (i, k, 0)),
                pl.BlockSpec((tb, ts, 1), lambda i, k: (i, k, 0)),
                # constant index_map -> weight/bias stay resident in VMEM
                pl.BlockSpec((D_in, d_out_p), lambda i, k: (0, 0)),
                pl.BlockSpec((1, d_out_p), lambda i, k: (0, 0)),
            ],
            out_specs=pl.BlockSpec((tb, d_out_p), lambda i, k: (i, 0)),
            scratch_shapes=[
                pltpu.VMEM((tb, D_in), jnp.float32),   # masked-sum accumulator
                pltpu.VMEM((tb, 1), jnp.float32),      # count accumulator
            ],
        ),
        compiler_params=pltpu.CompilerParams(
            dimension_semantics=("parallel", "arbitrary"),
            vmem_limit_bytes=vmem_limit,
        ),
        cost_estimate=cost,
    )(h, m3, w_p, b_p)

    return out_p[:B, :D_out]


def reference_forward(word_hidden, word_mask, weight, bias):
    m = word_mask.astype(jnp.float32)
    summed = jnp.sum(word_hidden * m[:, :, None], axis=1)
    cnt = jnp.maximum(jnp.sum(m, axis=1, keepdims=True), 1.0)
    pooled = summed / cnt
    return pooled @ weight + bias


if __name__ == "__main__":
    # combine_config = {'input_dim': 32, 'dim': 16}
    B, S, D_in, D_out = 2, 8, 32, 16

    key = jax.random.PRNGKey(0)
    k_h, k_m, k_w, k_b = jax.random.split(key, 4)

    word_hidden = jax.random.normal(k_h, (B, S, D_in), dtype=jnp.float32)
    # deterministic mask: first row has 5 valid tokens, second has 8
    word_mask = jnp.stack(
        [
            (jnp.arange(S) < 5).astype(jnp.float32),
            (jnp.arange(S) < 8).astype(jnp.float32),
        ],
        axis=0,
    )

    # deterministic parameter init for reduce_linear (Linear(input_dim, dim))
    bound = 1.0 / jnp.sqrt(jnp.float32(D_in))
    weight = jax.random.uniform(k_w, (D_in, D_out), jnp.float32, -bound, bound)
    bias = jax.random.uniform(k_b, (D_out,), jnp.float32, -bound, bound)

    out = combiner_forward(word_hidden, word_mask, weight, bias)
    out = jax.block_until_ready(out)

    ref = reference_forward(word_hidden, word_mask, weight, bias)
    assert out.shape == (B, D_out)
    # tolerance accounts for the EUP approximate-reciprocal (~1e-4 rel error)
    assert jnp.allclose(out, ref, atol=2e-3, rtol=2e-3), "mismatch vs reference"

    print("KERNEL_OK")
</pallas_src>

<mosaic_0001>
module attributes {stable_mosaic.version = 11 : i64} {
  func.func @_combiner_kernel(%arg0: i32, %arg1: i32, %arg2: memref<2x8x32xf32, #tpu.memory_space<vmem>>, %arg3: memref<2x8x1xf32, #tpu.memory_space<vmem>>, %arg4: memref<32x128xf32, #tpu.memory_space<vmem>>, %arg5: memref<1x128xf32, #tpu.memory_space<vmem>>, %arg6: memref<2x128xf32, #tpu.memory_space<vmem>>, %arg7: memref<2x32xf32, #tpu.memory_space<vmem>>, %arg8: memref<2x1xf32, #tpu.memory_space<vmem>>) attributes {dimension_semantics = [#tpu.dimension_semantics<parallel>, #tpu.dimension_semantics<arbitrary>], iteration_bounds = array<i64: 1, 1>, scalar_prefetch = 0 : i64, scratch_operands = 2 : i64, tpu.core_type = #tpu.core_type<tc>, window_params = [{transform_indices = @transform_0, window_bounds = array<i64: 2, 8, 32>}, {transform_indices = @transform_1, window_bounds = array<i64: 2, 8, 1>}, {pipeline_mode = #tpu.pipeline_mode<synchronous>, transform_indices = @transform_2, window_bounds = array<i64: 32, 128>}, {pipeline_mode = #tpu.pipeline_mode<synchronous>, transform_indices = @transform_3, window_bounds = array<i64: 1, 128>}, {transform_indices = @transform_4, window_bounds = array<i64: 2, 128>}]} {
    %c0_i32 = arith.constant 0 : i32
    %0 = arith.cmpi eq, %arg1, %c0_i32 : i32
    %1 = arith.extui %0 : i1 to i32
    %c0_i32_0 = arith.constant 0 : i32
    %2 = arith.cmpi ne, %1, %c0_i32_0 : i32
    scf.if %2 {
      %cst_17 = arith.constant 0.000000e+00 : f32
      %18 = vector.broadcast %cst_17 : f32 to vector<2x32xf32>
      %c0_18 = arith.constant 0 : index
      %c0_19 = arith.constant 0 : index
      %19 = vector.load %arg7[%c0_18, %c0_19] : memref<2x32xf32, #tpu.memory_space<vmem>>, vector<2x32xf32>
      tpu.vector_store %arg7[%c0_18, %c0_19], %18 {strides = array<i32>} : memref<2x32xf32, #tpu.memory_space<vmem>>, vector<2x32xf32>,
      %cst_20 = arith.constant 0.000000e+00 : f32
      %20 = vector.broadcast %cst_20 : f32 to vector<2x1xf32>
      %c0_21 = arith.constant 0 : index
      %c0_22 = arith.constant 0 : index
      %21 = vector.load %arg8[%c0_21, %c0_22] : memref<2x1xf32, #tpu.memory_space<vmem>>, vector<2x1xf32>
      tpu.vector_store %arg8[%c0_21, %c0_22], %20 {strides = array<i32>} : memref<2x1xf32, #tpu.memory_space<vmem>>, vector<2x1xf32>,
    } else {
    }
    %c0 = arith.constant 0 : index
    %c0_1 = arith.constant 0 : index
    %c0_2 = arith.constant 0 : index
    %3 = vector.load %arg2[%c0, %c0_1, %c0_2] : memref<2x8x32xf32, #tpu.memory_space<vmem>>, vector<2x8x32xf32>
    %c0_3 = arith.constant 0 : index
    %c0_4 = arith.constant 0 : index
    %c0_5 = arith.constant 0 : index
    %4 = vector.load %arg3[%c0_3, %c0_4, %c0_5] : memref<2x8x1xf32, #tpu.memory_space<vmem>>, vector<2x8x1xf32>
    %c0_6 = arith.constant 0 : index
    %c0_7 = arith.constant 0 : index
    %5 = vector.load %arg7[%c0_6, %c0_7] : memref<2x32xf32, #tpu.memory_space<vmem>>, vector<2x32xf32>
    %6 = vector.broadcast %4 : vector<2x8x1xf32> to vector<2x8x32xf32>
    %7 = arith.mulf %3, %6 : vector<2x8x32xf32>
    %cst = arith.constant dense<0.000000e+00> : vector<2x32xf32>
    %8 = vector.multi_reduction <add>, %7, %cst [1] : vector<2x8x32xf32> to vector<2x32xf32>
    %9 = arith.addf %5, %8 : vector<2x32xf32>
    %c0_8 = arith.constant 0 : index
    %c0_9 = arith.constant 0 : index
    %10 = vector.load %arg7[%c0_8, %c0_9] : memref<2x32xf32, #tpu.memory_space<vmem>>, vector<2x32xf32>
    tpu.vector_store %arg7[%c0_8, %c0_9], %9 {strides = array<i32>} : memref<2x32xf32, #tpu.memory_space<vmem>>, vector<2x32xf32>,
    %c0_10 = arith.constant 0 : index
    %c0_11 = arith.constant 0 : index
    %11 = vector.load %arg8[%c0_10, %c0_11] : memref<2x1xf32, #tpu.memory_space<vmem>>, vector<2x1xf32>
    %cst_12 = arith.constant dense<0.000000e+00> : vector<2x1xf32>
    %12 = vector.multi_reduction <add>, %4, %cst_12 [1] : vector<2x8x1xf32> to vector<2x1xf32>
    %13 = arith.addf %11, %12 : vector<2x1xf32>
    %c0_13 = arith.constant 0 : index
    %c0_14 = arith.constant 0 : index
    %14 = vector.load %arg8[%c0_13, %c0_14] : memref<2x1xf32, #tpu.memory_space<vmem>>, vector<2x1xf32>
    tpu.vector_store %arg8[%c0_13, %c0_14], %13 {strides = array<i32>} : memref<2x1xf32, #tpu.memory_space<vmem>>, vector<2x1xf32>,
    %c0_i32_15 = arith.constant 0 : i32
    %15 = arith.cmpi eq, %arg1, %c0_i32_15 : i32
    %16 = arith.extui %15 : i1 to i32
    %c0_i32_16 = arith.constant 0 : i32
    %17 = arith.cmpi ne, %16, %c0_i32_16 : i32
    scf.if %17 {
      %c0_17 = arith.constant 0 : index
      %c0_18 = arith.constant 0 : index
      %18 = vector.load %arg8[%c0_17, %c0_18] : memref<2x1xf32, #tpu.memory_space<vmem>>, vector<2x1xf32>
      %cst_19 = arith.constant 1.000000e+00 : f32
      %19 = vector.broadcast %cst_19 : f32 to vector<2x1xf32>
      %20 = arith.maximumf %18, %19 : vector<2x1xf32>
      %c0_20 = arith.constant 0 : index
      %c0_21 = arith.constant 0 : index
      %21 = vector.load %arg7[%c0_20, %c0_21] : memref<2x32xf32, #tpu.memory_space<vmem>>, vector<2x32xf32>
      %22 = tpu.reciprocal %20 {approx = true} : vector<2x1xf32> -> vector<2x1xf32>
      %23 = vector.broadcast %22 : vector<2x1xf32> to vector<2x32xf32>
      %24 = arith.mulf %21, %23 : vector<2x32xf32>
      %c0_22 = arith.constant 0 : index
      %c0_23 = arith.constant 0 : index
      %25 = vector.load %arg4[%c0_22, %c0_23] : memref<32x128xf32, #tpu.memory_space<vmem>>, vector<32x128xf32>
      %cst_24 = arith.constant dense<0.000000e+00> : vector<2x128xf32>
      %26 = tpu.matmul %24, %25, %cst_24 {dimension_numbers = #tpu.dot_dimension_numbers<[1], [0], [0], [1], [0, 0, 1, 1], [], []>} : vector<2x32xf32>, vector<32x128xf32>, vector<2x128xf32> -> vector<2x128xf32>
      %c0_25 = arith.constant 0 : index
      %c0_26 = arith.constant 0 : index
      %27 = vector.load %arg5[%c0_25, %c0_26] : memref<1x128xf32, #tpu.memory_space<vmem>>, vector<1x128xf32>
      %28 = vector.broadcast %27 : vector<1x128xf32> to vector<2x128xf32>
      %29 = arith.addf %26, %28 : vector<2x128xf32>
      %c0_27 = arith.constant 0 : index
      %c0_28 = arith.constant 0 : index
      %30 = vector.load %arg6[%c0_27, %c0_28] : memref<2x128xf32, #tpu.memory_space<vmem>>, vector<2x128xf32>
      tpu.vector_store %arg6[%c0_27, %c0_28], %29 {strides = array<i32>} : memref<2x128xf32, #tpu.memory_space<vmem>>, vector<2x128xf32>,
    } else {
    }
    return
  }
  func.func @transform_0(%arg0: i32, %arg1: i32) -> (i32, i32, i32) {
    %c0_i32 = arith.constant 0 : i32
    %c0_i32_0 = arith.constant 0 : i32
    return %arg0, %arg1, %c0_i32 : i32, i32, i32
  }
  func.func @transform_1(%arg0: i32, %arg1: i32) -> (i32, i32, i32) {
    %c0_i32 = arith.constant 0 : i32
    %c0_i32_0 = arith.constant 0 : i32
    return %arg0, %arg1, %c0_i32 : i32, i32, i32
  }
  func.func @transform_2(%arg0: i32, %arg1: i32) -> (i32, i32) {
    %c0_i32 = arith.constant 0 : i32
    %c0_i32_0 = arith.constant 0 : i32
    %c0_i32_1 = arith.constant 0 : i32
    return %c0_i32, %c0_i32_0 : i32, i32
  }
  func.func @transform_3(%arg0: i32, %arg1: i32) -> (i32, i32) {
    %c0_i32 = arith.constant 0 : i32
    %c0_i32_0 = arith.constant 0 : i32
    %c0_i32_1 = arith.constant 0 : i32
    return %c0_i32, %c0_i32_0 : i32, i32
  }
  func.func @transform_4(%arg0: i32, %arg1: i32) -> (i32, i32) {
    %c0_i32 = arith.constant 0 : i32
    %c0_i32_0 = arith.constant 0 : i32
    return %arg0, %c0_i32 : i32, i32
  }
}

</mosaic_0001>

<bundles_post_ra>
// kernel: tpu_custom_call.1
= control target key start
LH: loop header
LB: loop body
LE: loop exit
PB: predicated region body
PF: predicated region fallthrough
CT: control target
= control target key end

     0   :  { %9 = vsyncpa [#allocation5], 0  ;;  %s292_s0 = inlined_call_operand.vmem [shape: f32[2,8,32], index: 0, kind: input, shape index: {}]   ;;  %s293_s1 = inlined_call_operand.vmem [shape: f32[2,8,1], index: 1, kind: input, shape index: {}]   ;;  %s294_s2 = inlined_call_operand.hbm [shape: f32[32,128], index: 2, kind: input, shape index: {}]   ;;  %s295_s3 = inlined_call_operand.vmem [shape: f32[1,128], index: 3, kind: input, shape index: {}]   ;;  %s296_s4 = inlined_call_operand.hbm [shape: f32[2,128], index: 4, kind: output, shape index: {}]  }
   0x1   :  { %10 = vsyncpa [#allocation6], 0  ;;  %s19_s17 = sshll.u32 %s294_s2, 4  ;;  %s231_s18 = smov [#allocation4]   ;;  %s20_s17 = int_to_ptr.hbm [resolvable:$true] %s19_s17 }
   0x2   :  { %s21_s19 = sshll.u32 %s231_s18, 4  ;;  %s232_s20 = smov 128   ;;  %s22_s19 = int_to_ptr.vmem [resolvable:$true] %s21_s19 }
   0x3   :  { %s233_s21 = smov 8  }
   0x4   :  { %27 = dma.hbm_to_vmem [thread:$0]  %s20_s17, 512, %s22_s19, [#allocation5], %s232_s20, %s232_s20, %s233_s21  }
   0x5   :  { %227 = dma.done.wait [#allocation5], 512  }
   0x6   :  { %228 = vsyncadd [#allocation5], 4294966784  ;;  %vm38_vm0 = vcmask 254976   ;;  %v234_v0 = vmov 0   ;;  %vm40_vm1 = vcmask 1024   ;;  %v235_v1 = vmov 0.0  }
   0x7   :  { %174 = vset.pattern.permute.xlu0 %v234_v0  ;;  %39 = vst.msk [vmem:[#allocation2] sm:$0x3] %vm38_vm0, %v235_v1  ;;  %175 = vset.pattern.permute.xlu1 %v234_v0  ;;  %vm83_vm2 = vcmask 7168   ;;  %v44_v2 = vld [vmem:[%s293_s1] sm:$0xff]  ;;  %v45_v3 = vld [vmem:[%s293_s1 + $0x8] sm:$0xff]  ;;  %vm76_vm3 = vcmask 1041409  }
   0x8   :  { %41 = vst.msk [vmem:[#allocation3] sm:$0x3] %vm40_vm1, %v235_v1  ;;  %49 = vperm.xlu0 %174, %v44_v2   ;;  %v84_v4 = vsel %vm83_vm2, %v44_v2, 0.0  ;;  %v91_v5 = vsel %vm83_vm2, %v45_v3, 0.0  ;;  %v121_v24 = vld [vmem:[#allocation4 + $0x18] sm:$0xff]  ;;  %v120_v25 = vld [vmem:[#allocation4 + $0x10] sm:$0xff] }
   0x9   :  { %v85_v6 = vrot.slane %v84_v4, 4  ;;  %v92_v7 = vrot.slane %v91_v5, 4  ;;  %141 = vmatpush.msra.mxu0 %v121_v24  ;;  %v119_v26 = vld [vmem:[#allocation4 + $0x8] sm:$0xff]  ;;  %v42_v27 = vld [vmem:[%s292_s0] sm:$0xff]  ;;  %vm59_vm4 = vcmask 261120   ;;  %s236_s29 = smov [#allocation7]  }
   0xa   :  { %v118_v31 = vld [vmem:[#allocation4] sm:$0xff]  ;;  %v176_v54 = vld [vmem:[%s295_s3] ss:$0 sm:$0xff]  ;;  %s155_s30 = sshll.u32 %s236_s29, 4  ;;  %s157_s7 = sshll.u32 %s296_s4, 4  ;;  %s156_s30 = int_to_ptr.vmem [resolvable:$true] %s155_s30  ;;  %s158_s7 = int_to_ptr.hbm [resolvable:$true] %s157_s7 }
   0xb   :  { %v86_v8 = vadd.f32 %v85_v6, %v84_v4  ;;  %v93_v9 = vadd.f32 %v92_v7, %v91_v5  ;;  %142 = vmatpush.msra.mxu0 %v120_v25  ;;  %v43_v33 = vld [vmem:[%s292_s0 + $0x8] sm:$0xff] }
   0xd   :  { %v87_v10 = vrot.slane %v86_v8, 2  ;;  %v94_v11 = vrot.slane %v93_v9, 2  ;;  %143 = vmatpush.msra.mxu0 %v119_v26 }
   0xe   :  { %v46_v48 = vld [vmem:[#allocation2] sm:$0x3] }
   0xf   :  { %v88_v12 = vadd.f32 %v87_v10, %v86_v8  ;;  %v95_v13 = vadd.f32 %v94_v11, %v93_v9  ;;  %v82_v18 = vld [vmem:[#allocation3] sm:$0x3]  ;;  %144 = vmatpush.msra.mxu0 %v118_v31 }
  0x10   :  { %54 = vperm.xlu0 %174, %v45_v3  }
  0x11   :  { %v89_v14 = vrot.slane %v88_v12, 1  ;;  %v96_v15 = vrot.slane %v95_v13, 1 }
  0x13   :  { %v90_v16 = vadd.f32 %v89_v14, %v88_v12  ;;  %v97_v17 = vadd.f32 %v96_v15, %v95_v13 }
  0x15   :  { %v100_v19 = vsel %vm76_vm3, %v97_v17, %v90_v16 }
  0x16   :  { %v102_v20 = vadd.f32 %v100_v19, %v82_v18 }
  0x18   :  { %104 = vst.msk [vmem:[#allocation3] sm:$0x3] %vm40_vm1, %v102_v20 }
  0x1f   :  { %v108_v21 = vld [vmem:[#allocation3] sm:$0x3] }
  0x20   :  { %v109_v22 = vmax.f32 %v108_v21, 1.0 }
  0x22   :  { %177 = vrcp.f32 %v109_v22 }
  0x28   :  { %v178_v23 = vpop.eup %177 }
  0x29   :  { %114 = vperm.xlu1 %175, %v178_v23  }
  0x7a   :  { %v50_v28 = vpop.permute.xlu0 %49 }
  0x7b   :  { %v57_v29 = vmul.f32 %v50_v28, %v42_v27 }
  0x7d   :  { %v60_v30 = vsel %vm59_vm4, %v57_v29, 0.0 }
  0x7e   :  { %v61_v32 = vrot.slane %v60_v30, 4 }
  0x80   :  { %v62_v34 = vadd.f32 %v61_v32, %v60_v30 }
  0x82   :  { %v55_v35 = vpop.permute.xlu0 %54  ;;  %v63_v37 = vrot.slane %v62_v34, 2 }
  0x83   :  { %v58_v36 = vmul.f32 %v55_v35, %v43_v33 }
  0x84   :  { %v64_v40 = vadd.f32 %v63_v37, %v62_v34 }
  0x85   :  { %v67_v38 = vsel %vm59_vm4, %v58_v36, 0.0 }
  0x86   :  { %v68_v39 = vrot.slane %v67_v38, 4  ;;  %v65_v43 = vrot.slane %v64_v40, 1 }
  0x88   :  { %v69_v41 = vadd.f32 %v68_v39, %v67_v38  ;;  %v66_v46 = vadd.f32 %v65_v43, %v64_v40 }
  0x8a   :  { %v70_v42 = vrot.slane %v69_v41, 2 }
  0x8c   :  { %v71_v44 = vadd.f32 %v70_v42, %v69_v41 }
  0x8e   :  { %v72_v45 = vrot.slane %v71_v44, 1 }
  0x90   :  { %v73_v47 = vadd.f32 %v72_v45, %v71_v44 }
  0x92   :  { %v77_v49 = vsel %vm76_vm3, %v73_v47, %v66_v46 }
  0x93   :  { %v79_v50 = vadd.f32 %v77_v49, %v46_v48 }
  0x95   :  { %81 = vst.msk [vmem:[#allocation2] sm:$0x3] %vm38_vm0, %v79_v50 }
  0x9b   :  { %v115_v51 = vpop.permute.xlu1 %114 }
  0x9c   :  { %v110_v52 = vld [vmem:[#allocation2] sm:$0x3] }
  0x9d   :  { %v117_v53 = vmul.f32 %v115_v51, %v110_v52 }
  0x9f   :  { %167 = vmatmul.msk.f32.vlgmr.msra.gmra.mxu0 %vm59_vm4, %v117_v53 }
 0x11c   :  { %v146_v55 = vpop.f32.mrf.mxu0 }
 0x11d   :  { %v147_v56 = vadd.f32 %v176_v54, %v146_v55 }
 0x11f   :  { %149 = vst [vmem:[#allocation7] sm:$0x3] %v147_v56 }
 0x120   :  { %160 = dma.vmem_to_hbm [thread:$0]  %s156_s30, 32, %s158_s7, [#allocation6]  }
 0x121   :  { %229 = dma.done.wait [#allocation6], 32  }
 0x122   :  { %230 = vsyncadd [#allocation6], 4294967264 }
 0x123   :  { %165 = vsyncpa [#allocation5], 1 }
 0x124   :  { %166 = vsyncpa [#allocation6], 1 }

</bundles_post_ra>
